<compile_context>
chip_gen: v5e
topology: v5e:2x2
jax: 0.10.0
libtpu: 0.0.40
codegen_flags: <defaults>
</compile_context>

<pallas_src>
import jax
import jax.numpy as jnp
from jax.experimental import pallas as pl
from jax.experimental.pallas import tpu as pltpu


def _round_up(n, m):
    return ((n + m - 1) // m) * m


def _mlp_kernel(x_ref, w1_ref, b1_ref, w2_ref, b2_ref, w3_ref, b3_ref, o_ref):
    cdt = w1_ref.dtype
    x = x_ref[...].astype(cdt)                                         # (TILE_B, F)
    h1 = jnp.dot(x, w1_ref[...], preferred_element_type=jnp.float32)   # (TILE_B, 64)
    h1 = jnp.maximum(h1 + b1_ref[...], 0.0)
    h2 = jnp.dot(h1.astype(cdt), w2_ref[...],
                 preferred_element_type=jnp.float32)                   # (TILE_B, 32)
    h2 = jnp.maximum(h2 + b2_ref[...], 0.0)
    # Final layer: w3 (1, H2) contracted with h2 (TILE_B, H2) over the hidden dim
    # -> (1, TILE_B).  Batch lands on lanes: lane-dense store, wide writeback DMA.
    out_row = jax.lax.dot_general(
        w3_ref[...], h2.astype(cdt),
        dimension_numbers=(((1,), (1,)), ((), ())),
        preferred_element_type=jnp.float32)                            # (1, TILE_B)
    o_ref[...] = (out_row + b3_ref[...]).astype(o_ref.dtype)


def _pick_tile_b(batch, feat, itemsize, max_tile=4096,
                 x_stream_budget=12 * 1024 * 1024):
    # Keep the double-buffered x stream within a VMEM budget that is safe on every
    # generation (v7x: 64 MiB physical / 32 MiB default scoped VMEM per TensorCore).
    cap = max(128, x_stream_budget // (2 * feat * itemsize))
    cap = max(128, (cap // 128) * 128)                # keep a multiple of 128 (lane-dense)
    return max(128, min(max_tile, cap, _round_up(batch, 128)))


def sales_predictor_forward(x, params, *, compute_dtype=jnp.bfloat16, tile_b=None):
    """x: (B, input_size). params: w1 (F,64), b1 (1,64), w2 (64,32), b2 (1,32),
    w3 (32,1), b3 (1,1) float32.  Returns (B, 1) float32."""
    B, F = x.shape
    H1 = params["w1"].shape[1]
    H2 = params["w2"].shape[1]

    w1 = params["w1"].astype(compute_dtype)
    w2 = params["w2"].astype(compute_dtype)
    w3 = params["w3"].reshape(1, H2).astype(compute_dtype)   # row layout for the kernel
    b1 = params["b1"].reshape(1, H1).astype(jnp.float32)
    b2 = params["b2"].reshape(1, H2).astype(jnp.float32)
    b3 = params["b3"].reshape(1, 1).astype(jnp.float32)

    itemsize = jnp.dtype(x.dtype).itemsize
    if tile_b is None:
        tile_b = _pick_tile_b(B, F, itemsize)
    b_pad = _round_up(B, tile_b)
    if b_pad != B:
        x = jnp.pad(x, ((0, b_pad - B), (0, 0)))
    num_tiles = b_pad // tile_b

    flops = 2 * b_pad * (F * H1 + H1 * H2 + H2)
    bytes_accessed = (
        b_pad * F * itemsize
        + sum(int(a.size) * jnp.dtype(a.dtype).itemsize
              for a in (w1, b1, w2, b2, w3, b3))
        + b_pad * 4)

    const = lambda shape: pl.BlockSpec(shape, lambda i: (0, 0))
    out2d = pl.pallas_call(
        _mlp_kernel,
        grid=(num_tiles,),
        out_shape=jax.ShapeDtypeStruct((1, b_pad), jnp.float32),
        in_specs=[
            pl.BlockSpec((tile_b, F), lambda i: (i, 0)),     # streamed x, double-buffered
            const(w1.shape), const(b1.shape),                # resident weights / biases
            const(w2.shape), const(b2.shape),
            const(w3.shape), const(b3.shape),
        ],
        out_specs=pl.BlockSpec((1, tile_b), lambda i: (0, i)),   # batch on lanes
        compiler_params=pltpu.CompilerParams(dimension_semantics=("parallel",)),
        cost_estimate=pl.CostEstimate(flops=flops, transcendentals=0,
                                      bytes_accessed=bytes_accessed),
    )(x, w1, b1, w2, b2, w3, b3)

    return out2d[0, :B].reshape(B, 1)


def init_params(key, input_size):
    """Deterministic init mirroring nn.Linear's U(-1/sqrt(fan_in), 1/sqrt(fan_in))."""
    dims = [(input_size, 64), (64, 32), (32, 1)]
    params = {}
    for i, (fin, fout) in enumerate(dims, start=1):
        key, kw, kb = jax.random.split(key, 3)
        bound = 1.0 / jnp.sqrt(float(fin))
        params[f"w{i}"] = jax.random.uniform(kw, (fin, fout), jnp.float32, -bound, bound)
        params[f"b{i}"] = jax.random.uniform(kb, (1, fout), jnp.float32, -bound, bound)
    return params


def reference_forward(x, params, compute_dtype=jnp.bfloat16):
    """Pure-JAX reference using the same bf16-input / f32-accumulate recipe as the kernel."""
    c = lambda a: a.astype(compute_dtype)
    h1 = jnp.maximum(
        jnp.dot(c(x), c(params["w1"]), preferred_element_type=jnp.float32)
        + params["b1"], 0.0)
    h2 = jnp.maximum(
        jnp.dot(c(h1), c(params["w2"]), preferred_element_type=jnp.float32)
        + params["b2"], 0.0)
    return (jnp.dot(c(h2), c(params["w3"]), preferred_element_type=jnp.float32)
            + params["b3"])


if __name__ == "__main__":
    key = jax.random.PRNGKey(0)
    key, kx = jax.random.split(key)

    batch, input_size = 8, 16
    x = jax.random.normal(kx, (batch, input_size), jnp.float32)
    params = init_params(key, input_size)

    out = jax.block_until_ready(sales_predictor_forward(x, params))
    ref = reference_forward(x, params)

    assert out.shape == (batch, 1)
    assert jnp.allclose(out, ref, atol=2e-3, rtol=2e-3), "mismatch vs JAX reference"
    print("KERNEL_OK")
</pallas_src>

<mosaic_0001>
module attributes {stable_mosaic.version = 11 : i64} {
  func.func @_mlp_kernel(%arg0: i32, %arg1: memref<128x16xf32, #tpu.memory_space<vmem>>, %arg2: memref<16x64xbf16, #tpu.memory_space<vmem>>, %arg3: memref<1x64xf32, #tpu.memory_space<vmem>>, %arg4: memref<64x32xbf16, #tpu.memory_space<vmem>>, %arg5: memref<1x32xf32, #tpu.memory_space<vmem>>, %arg6: memref<1x32xbf16, #tpu.memory_space<vmem>>, %arg7: memref<1x1xf32, #tpu.memory_space<vmem>>, %arg8: memref<1x128xf32, #tpu.memory_space<vmem>>) attributes {dimension_semantics = [#tpu.dimension_semantics<parallel>], iteration_bounds = array<i64: 1>, scalar_prefetch = 0 : i64, scratch_operands = 0 : i64, tpu.core_type = #tpu.core_type<tc>, window_params = [{transform_indices = @transform_0, window_bounds = array<i64: 128, 16>}, {pipeline_mode = #tpu.pipeline_mode<synchronous>, transform_indices = @transform_1, window_bounds = array<i64: 16, 64>}, {pipeline_mode = #tpu.pipeline_mode<synchronous>, transform_indices = @transform_2, window_bounds = array<i64: 1, 64>}, {pipeline_mode = #tpu.pipeline_mode<synchronous>, transform_indices = @transform_3, window_bounds = array<i64: 64, 32>}, {pipeline_mode = #tpu.pipeline_mode<synchronous>, transform_indices = @transform_4, window_bounds = array<i64: 1, 32>}, {pipeline_mode = #tpu.pipeline_mode<synchronous>, transform_indices = @transform_5, window_bounds = array<i64: 1, 32>}, {pipeline_mode = #tpu.pipeline_mode<synchronous>, transform_indices = @transform_6, window_bounds = array<i64: 1, 1>}, {transform_indices = @transform_7, window_bounds = array<i64: 1, 128>}]} {
    %c0 = arith.constant 0 : index
    %c0_0 = arith.constant 0 : index
    %0 = vector.load %arg1[%c0, %c0_0] : memref<128x16xf32, #tpu.memory_space<vmem>>, vector<128x16xf32>
    %1 = arith.truncf %0 : vector<128x16xf32> to vector<128x16xbf16>
    %c0_1 = arith.constant 0 : index
    %c0_2 = arith.constant 0 : index
    %2 = vector.load %arg2[%c0_1, %c0_2] : memref<16x64xbf16, #tpu.memory_space<vmem>>, vector<16x64xbf16>
    %cst = arith.constant dense<0.000000e+00> : vector<128x64xf32>
    %3 = tpu.matmul %1, %2, %cst {dimension_numbers = #tpu.dot_dimension_numbers<[1], [0], [0], [1], [0, 0, 1, 1], [], []>} : vector<128x16xbf16>, vector<16x64xbf16>, vector<128x64xf32> -> vector<128x64xf32>
    %c0_3 = arith.constant 0 : index
    %c0_4 = arith.constant 0 : index
    %4 = vector.load %arg3[%c0_3, %c0_4] : memref<1x64xf32, #tpu.memory_space<vmem>>, vector<1x64xf32>
    %5 = vector.broadcast %4 : vector<1x64xf32> to vector<128x64xf32>
    %6 = arith.addf %3, %5 : vector<128x64xf32>
    %cst_5 = arith.constant 0.000000e+00 : f32
    %7 = vector.broadcast %cst_5 : f32 to vector<128x64xf32>
    %8 = arith.maximumf %6, %7 : vector<128x64xf32>
    %9 = arith.truncf %8 : vector<128x64xf32> to vector<128x64xbf16>
    %c0_6 = arith.constant 0 : index
    %c0_7 = arith.constant 0 : index
    %10 = vector.load %arg4[%c0_6, %c0_7] : memref<64x32xbf16, #tpu.memory_space<vmem>>, vector<64x32xbf16>
    %cst_8 = arith.constant dense<0.000000e+00> : vector<128x32xf32>
    %11 = tpu.matmul %9, %10, %cst_8 {dimension_numbers = #tpu.dot_dimension_numbers<[1], [0], [0], [1], [0, 0, 1, 1], [], []>} : vector<128x64xbf16>, vector<64x32xbf16>, vector<128x32xf32> -> vector<128x32xf32>
    %c0_9 = arith.constant 0 : index
    %c0_10 = arith.constant 0 : index
    %12 = vector.load %arg5[%c0_9, %c0_10] : memref<1x32xf32, #tpu.memory_space<vmem>>, vector<1x32xf32>
    %13 = vector.broadcast %12 : vector<1x32xf32> to vector<128x32xf32>
    %14 = arith.addf %11, %13 : vector<128x32xf32>
    %cst_11 = arith.constant 0.000000e+00 : f32
    %15 = vector.broadcast %cst_11 : f32 to vector<128x32xf32>
    %16 = arith.maximumf %14, %15 : vector<128x32xf32>
    %c0_12 = arith.constant 0 : index
    %c0_13 = arith.constant 0 : index
    %17 = vector.load %arg6[%c0_12, %c0_13] : memref<1x32xbf16, #tpu.memory_space<vmem>>, vector<1x32xbf16>
    %18 = arith.truncf %16 : vector<128x32xf32> to vector<128x32xbf16>
    %cst_14 = arith.constant dense<0.000000e+00> : vector<1x128xf32>
    %19 = tpu.matmul %17, %18, %cst_14 {dimension_numbers = #tpu.dot_dimension_numbers<[1], [1], [0], [0], [0, 0, 1, 0], [], []>} : vector<1x32xbf16>, vector<128x32xbf16>, vector<1x128xf32> -> vector<1x128xf32>
    %c0_15 = arith.constant 0 : index
    %c0_16 = arith.constant 0 : index
    %20 = vector.load %arg7[%c0_15, %c0_16] : memref<1x1xf32, #tpu.memory_space<vmem>>, vector<1x1xf32>
    %21 = vector.broadcast %20 : vector<1x1xf32> to vector<1x128xf32>
    %22 = arith.addf %19, %21 : vector<1x128xf32>
    %c0_17 = arith.constant 0 : index
    %c0_18 = arith.constant 0 : index
    %23 = vector.load %arg8[%c0_17, %c0_18] : memref<1x128xf32, #tpu.memory_space<vmem>>, vector<1x128xf32>
    tpu.vector_store %arg8[%c0_17, %c0_18], %22 {strides = array<i32>} : memref<1x128xf32, #tpu.memory_space<vmem>>, vector<1x128xf32>,
    return
  }
  func.func @transform_0(%arg0: i32) -> (i32, i32) {
    %c0_i32 = arith.constant 0 : i32
    %c0_i32_0 = arith.constant 0 : i32
    return %arg0, %c0_i32 : i32, i32
  }
  func.func @transform_1(%arg0: i32) -> (i32, i32) {
    %c0_i32 = arith.constant 0 : i32
    %c0_i32_0 = arith.constant 0 : i32
    %c0_i32_1 = arith.constant 0 : i32
    return %c0_i32, %c0_i32_0 : i32, i32
  }
  func.func @transform_2(%arg0: i32) -> (i32, i32) {
    %c0_i32 = arith.constant 0 : i32
    %c0_i32_0 = arith.constant 0 : i32
    %c0_i32_1 = arith.constant 0 : i32
    return %c0_i32, %c0_i32_0 : i32, i32
  }
  func.func @transform_3(%arg0: i32) -> (i32, i32) {
    %c0_i32 = arith.constant 0 : i32
    %c0_i32_0 = arith.constant 0 : i32
    %c0_i32_1 = arith.constant 0 : i32
    return %c0_i32, %c0_i32_0 : i32, i32
  }
  func.func @transform_4(%arg0: i32) -> (i32, i32) {
    %c0_i32 = arith.constant 0 : i32
    %c0_i32_0 = arith.constant 0 : i32
    %c0_i32_1 = arith.constant 0 : i32
    return %c0_i32, %c0_i32_0 : i32, i32
  }
  func.func @transform_5(%arg0: i32) -> (i32, i32) {
    %c0_i32 = arith.constant 0 : i32
    %c0_i32_0 = arith.constant 0 : i32
    %c0_i32_1 = arith.constant 0 : i32
    return %c0_i32, %c0_i32_0 : i32, i32
  }
  func.func @transform_6(%arg0: i32) -> (i32, i32) {
    %c0_i32 = arith.constant 0 : i32
    %c0_i32_0 = arith.constant 0 : i32
    %c0_i32_1 = arith.constant 0 : i32
    return %c0_i32, %c0_i32_0 : i32, i32
  }
  func.func @transform_7(%arg0: i32) -> (i32, i32) {
    %c0_i32 = arith.constant 0 : i32
    %c0_i32_0 = arith.constant 0 : i32
    return %c0_i32, %arg0 : i32, i32
  }
}

</mosaic_0001>

<bundles_post_ra>
// kernel: tpu_custom_call.1
= control target key start
LH: loop header
LB: loop body
LE: loop exit
PB: predicated region body
PF: predicated region fallthrough
CT: control target
= control target key end

     0   :  { %s590_s0 = inlined_call_operand.vmem [shape: f32[128,16], index: 0, kind: input, shape index: {}]   ;;  %s591_s1 = inlined_call_operand.vmem [shape: bf16[16,64], index: 1, kind: input, shape index: {}]   ;;  %s592_s2 = inlined_call_operand.vmem [shape: f32[1,64], index: 2, kind: input, shape index: {}]   ;;  %s593_s3 = inlined_call_operand.vmem [shape: bf16[64,32], index: 3, kind: input, shape index: {}]   ;;  %s594_s4 = inlined_call_operand.vmem [shape: f32[1,32], index: 4, kind: input, shape index: {}]   ;;  %s595_s5 = inlined_call_operand.vmem [shape: bf16[1,32], index: 5, kind: input, shape index: {}]   ;;  %s596_s6 = inlined_call_operand.<no memory space> [shape: f32[1,1], index: 6, kind: input, shape index: {}]   ;;  %s597_s7 = inlined_call_operand.hbm [shape: f32[1,128], index: 7, kind: output, shape index: {}]  }
   0x1   :  { %v12_v0 = vstv %s596_s6 }
   0x2   :  { %13 = vst [vmem:[#allocation2] sm:$0x1] %v12_v0 }
   0x3   :  { %v401_v1 = vld [vmem:[%s591_s1] sm:$0xff]  ;;  %v31_v3 = vld [vmem:[%s590_s0 + $0x8] sm:$0xff]  ;;  %vm66_vm0 = vcmask 130048  }
   0x4   :  { %v30_v2 = vld [vmem:[%s590_s0] sm:$0xff]  ;;  %98 = vmatpush.bf16.msra.mxu0 %v401_v1  ;;  %406 = vmatpush.bf16.msra.mxu3 %v401_v1 }
   0x5   :  { %v46_v4 = vpack.c.bf16 %v31_v3, %v30_v2 }
   0x6   :  { %14 = vsyncpa [#allocation4], 0  ;;  %v32_v5 = vld [vmem:[%s590_s0 + $0x10] sm:$0xff]  ;;  %v33_v6 = vld [vmem:[%s590_s0 + $0x18] sm:$0xff]  ;;  %vm200_vm1 = vcmask 523264   ;;  %vm306_vm2 = vcmask 261120  }
   0x7   :  { %368 = vmatmul.msk.bf16.vlgmr.msra.gmra.mxu0 %vm66_vm0, %v46_v4  ;;  %v47_v7 = vpack.c.bf16 %v33_v6, %v32_v5  ;;  %v34_v8 = vld [vmem:[%s590_s0 + $0x20] sm:$0xff]  ;;  %v35_v9 = vld [vmem:[%s590_s0 + $0x28] sm:$0xff]  ;;  %v36_v11 = vld [vmem:[%s590_s0 + $0x30] sm:$0xff]  ;;  %s443_s20 = smov [#allocation3]   ;;  %s355_s24 = sshll.u32 %s597_s7, 4  ;;  %s356_s24 = int_to_ptr.hbm [resolvable:$true] %s355_s24 }
   0x8   :  { %v48_v10 = vpack.c.bf16 %v35_v9, %v34_v8  ;;  %v37_v12 = vld [vmem:[%s590_s0 + $0x38] sm:$0xff]  ;;  %v42_v14 = vld [vmem:[%s590_s0 + $0x60] sm:$0xff]  ;;  %v43_v15 = vld [vmem:[%s590_s0 + $0x68] sm:$0xff]  ;;  %s353_s21 = sshll.u32 %s443_s20, 4  ;;  %s354_s21 = int_to_ptr.vmem [resolvable:$true] %s353_s21 }
   0x9   :  { %v49_v13 = vpack.c.bf16 %v37_v12, %v36_v11  ;;  %v52_v16 = vpack.c.bf16 %v43_v15, %v42_v14  ;;  %v38_v17 = vld [vmem:[%s590_s0 + $0x40] sm:$0xff]  ;;  %v39_v18 = vld [vmem:[%s590_s0 + $0x48] sm:$0xff]  ;;  %v44_v19 = vld [vmem:[%s590_s0 + $0x70] sm:$0xff] }
   0xa   :  { %v45_v20 = vld [vmem:[%s590_s0 + $0x78] sm:$0xff]  ;;  %v50_v21 = vpack.c.bf16 %v39_v18, %v38_v17  ;;  %v40_v23 = vld [vmem:[%s590_s0 + $0x50] sm:$0xff]  ;;  %v403_v28 = vld [vmem:[%s593_s3 + $0x8] sm:$0xff] }
   0xb   :  { %374 = vmatmul.msk.bf16.vlgmr.msra.gmra.mxu3 %vm66_vm0, %v52_v16  ;;  %v53_v22 = vpack.c.bf16 %v45_v20, %v44_v19  ;;  %v41_v24 = vld [vmem:[%s590_s0 + $0x58] sm:$0xff]  ;;  %v404_v27 = vld [vmem:[%s593_s3 + $0x10] sm:$0xff]  ;;  %v402_v29 = vld [vmem:[%s593_s3] sm:$0xff] }
   0xc   :  { %v51_v25 = vpack.c.bf16 %v41_v24, %v40_v23  ;;  %v405_v26 = vld [vmem:[%s593_s3 + $0x18] sm:$0xff]  ;;  %v414_v31 = vld [vmem:[%s592_s2] ss:$0 sm:$0xff] }
   0xd   :  { %229 = vmatpush.bf16.msra.mxu1 %v405_v26  ;;  %407 = vmatpush.bf16.msrb.mxu3 %v405_v26  ;;  %v415_v24 = vld [vmem:[%s594_s4] ss:$0 sm:$0xff] }
  0x11   :  { %230 = vmatpush.bf16.msra.mxu1 %v404_v27  ;;  %408 = vmatpush.bf16.msrb.mxu3 %v404_v27 }
  0x15   :  { %231 = vmatpush.bf16.msra.mxu1 %v403_v28  ;;  %409 = vmatpush.bf16.msrb.mxu3 %v403_v28 }
  0x17   :  { %369 = vmatmul.msk.bf16.gmra.mxu0 %vm66_vm0, %v47_v7 }
  0x19   :  { %232 = vmatpush.bf16.msra.mxu1 %v402_v29  ;;  %410 = vmatpush.bf16.msrb.mxu3 %v402_v29 }
  0x1b   :  { %375 = vmatmul.msk.bf16.gmra.mxu3 %vm66_vm0, %v53_v22 }
  0x27   :  { %370 = vmatmul.msk.bf16.gmra.mxu0 %vm66_vm0, %v48_v10 }
  0x37   :  { %371 = vmatmul.msk.bf16.gmra.mxu0 %vm66_vm0, %v49_v13 }
  0x47   :  { %372 = vmatmul.msk.bf16.gmra.mxu0 %vm66_vm0, %v50_v21 }
  0x57   :  { %373 = vmatmul.msk.bf16.gmra.mxu0 %vm66_vm0, %v51_v25 }
  0x84   :  { %v100_v30 = vpop.f32.mrf.mxu0 }
  0x85   :  { %v101_v32 = vadd.f32 %v414_v31, %v100_v30 }
  0x87   :  { %v140_v35 = vmax.f32 %v101_v32, 0.0 }
  0x8c   :  { %v102_v33 = vpop.f32.mrf.mxu0 }
  0x8d   :  { %v103_v34 = vadd.f32 %v414_v31, %v102_v33 }
  0x8e   :  { %v130_v3 = vpop.f32.mrf.mxu3 }
  0x8f   :  { %v141_v36 = vmax.f32 %v103_v34, 0.0  ;;  %v131_v11 = vadd.f32 %v414_v31, %v130_v3 }
  0x91   :  { %v156_v37 = vpack.c.bf16 %v141_v36, %v140_v35  ;;  %v152_v14 = vmax.f32 %v131_v11, 0.0 }
  0x93   :  { %392 = vmatmul.msk.bf16.vlgmr.msra.gmra.mxu1 %vm200_vm1, %v156_v37 }
  0x94   :  { %v105_v38 = vpop.f32.mrf.mxu0 }
  0x95   :  { %v106_v39 = vadd.f32 %v414_v31, %v105_v38 }
  0x96   :  { %v132_v10 = vpop.f32.mrf.mxu3 }
  0x97   :  { %v142_v42 = vmax.f32 %v106_v39, 0.0  ;;  %v133_v12 = vadd.f32 %v414_v31, %v132_v10 }
  0x99   :  { %v153_v15 = vmax.f32 %v133_v12, 0.0 }
  0x9b   :  { %v162_v16 = vpack.c.bf16 %v153_v15, %v152_v14 }
  0x9c   :  { %v107_v40 = vpop.f32.mrf.mxu0 }
  0x9d   :  { %v108_v41 = vadd.f32 %v414_v31, %v107_v40 }
  0x9e   :  { %v135_v13 = vpop.f32.mrf.mxu3 }
  0x9f   :  { %v143_v43 = vmax.f32 %v108_v41, 0.0  ;;  %v136_v18 = vadd.f32 %v414_v31, %v135_v13 }
  0xa1   :  { %v157_v44 = vpack.c.bf16 %v143_v43, %v142_v42  ;;  %v154_v20 = vmax.f32 %v136_v18, 0.0 }
  0xa3   :  { %393 = vmatmul.msk.bf16.gmra.mxu1 %vm200_vm1, %v157_v44 }
  0xa4   :  { %v110_v45 = vpop.f32.mrf.mxu0 }
  0xa5   :  { %v111_v46 = vadd.f32 %v414_v31, %v110_v45 }
  0xa6   :  { %v137_v17 = vpop.f32.mrf.mxu3 }
  0xa7   :  { %v144_v49 = vmax.f32 %v111_v46, 0.0  ;;  %v138_v19 = vadd.f32 %v414_v31, %v137_v17 }
  0xa9   :  { %v155_v21 = vmax.f32 %v138_v19, 0.0  ;;  %v299_v19 = vld [vmem:[#allocation2] sm:$0x1] }
  0xab   :  { %v163_v22 = vpack.c.bf16 %v155_v21, %v154_v20  ;;  %v442_v20 = vmov 0  }
  0xac   :  { %v112_v47 = vpop.f32.mrf.mxu0  ;;  %413 = vset.pattern.permute.xlu0 %v442_v20 }
  0xad   :  { %v113_v48 = vadd.f32 %v414_v31, %v112_v47  ;;  %302 = vperm.xlu0 %413, %v299_v19  }
  0xaf   :  { %v145_v50 = vmax.f32 %v113_v48, 0.0 }
  0xb1   :  { %v158_v51 = vpack.c.bf16 %v145_v50, %v144_v49 }
  0xb3   :  { %394 = vmatmul.msk.bf16.gmra.mxu1 %vm200_vm1, %v158_v51 }
  0xb4   :  { %v115_v52 = vpop.f32.mrf.mxu0 }
  0xb5   :  { %v116_v53 = vadd.f32 %v414_v31, %v115_v52 }
  0xb7   :  { %v146_v56 = vmax.f32 %v116_v53, 0.0 }
  0xbc   :  { %v117_v54 = vpop.f32.mrf.mxu0 }
  0xbd   :  { %v118_v55 = vadd.f32 %v414_v31, %v117_v54 }
  0xbf   :  { %v147_v57 = vmax.f32 %v118_v55, 0.0 }
  0xc1   :  { %v159_v58 = vpack.c.bf16 %v147_v57, %v146_v56 }
  0xc3   :  { %395 = vmatmul.msk.bf16.gmra.mxu1 %vm200_vm1, %v159_v58 }
  0xc4   :  { %v120_v59 = vpop.f32.mrf.mxu0 }
  0xc5   :  { %v121_v60 = vadd.f32 %v414_v31, %v120_v59 }
  0xc7   :  { %v148_v63 = vmax.f32 %v121_v60, 0.0 }
  0xcc   :  { %v122_v61 = vpop.f32.mrf.mxu0 }
  0xcd   :  { %v123_v62 = vadd.f32 %v414_v31, %v122_v61 }
  0xcf   :  { %v149_v0 = vmax.f32 %v123_v62, 0.0 }
  0xd1   :  { %v160_v1 = vpack.c.bf16 %v149_v0, %v148_v63 }
  0xd3   :  { %396 = vmatmul.msk.bf16.gmra.mxu1 %vm200_vm1, %v160_v1 }
  0xd4   :  { %v125_v2 = vpop.f32.mrf.mxu0 }
  0xd5   :  { %v126_v4 = vadd.f32 %v414_v31, %v125_v2 }
  0xd7   :  { %v150_v7 = vmax.f32 %v126_v4, 0.0 }
  0xdc   :  { %v127_v5 = vpop.f32.mrf.mxu0 }
  0xdd   :  { %v128_v6 = vadd.f32 %v414_v31, %v127_v5 }
  0xdf   :  { %v151_v8 = vmax.f32 %v128_v6, 0.0 }
  0xe1   :  { %v161_v9 = vpack.c.bf16 %v151_v8, %v150_v7 }
  0xe3   :  { %397 = vmatmul.msk.bf16.vlgmr.msrb.gmra.mxu3 %vm200_vm1, %v161_v9 }
  0xf3   :  { %398 = vmatmul.msk.bf16.gmra.mxu3 %vm200_vm1, %v162_v16 }
 0x103   :  { %399 = vmatmul.msk.bf16.gmra.mxu3 %vm200_vm1, %v163_v22 }
 0x110   :  { %v234_v23 = vpop.f32.mrf.mxu1 }
 0x111   :  { %v235_v25 = vadd.f32 %v415_v24, %v234_v23 }
 0x113   :  { %v274_v28 = vmax.f32 %v235_v25, 0.0 }
 0x118   :  { %v236_v26 = vpop.f32.mrf.mxu1 }
 0x119   :  { %v237_v27 = vadd.f32 %v415_v24, %v236_v26 }
 0x11b   :  { %v275_v29 = vmax.f32 %v237_v27, 0.0 }
 0x11d   :  { %v572_v30 = vpack.c.bf16 %v275_v29, %v274_v28 }
 0x11f   :  { %v311_v26 = vsel %vm306_vm2, %v572_v30, 0  ;;  %v303_v27 = vpop.permute.xlu0 %302 }
 0x120   :  { %v239_v32 = vpop.f32.mrf.mxu1  ;;  %v305_v28 = vperm.slane %v303_v27, 0 }
 0x121   :  { %v240_v33 = vadd.f32 %v415_v24, %v239_v32 }
 0x123   :  { %v276_v35 = vmax.f32 %v240_v33, 0.0 }
 0x128   :  { %v241_v31 = vpop.f32.mrf.mxu1 }
 0x129   :  { %v242_v34 = vadd.f32 %v415_v24, %v241_v31 }
 0x12b   :  { %v277_v36 = vmax.f32 %v242_v34, 0.0 }
 0x12d   :  { %v292_v37 = vpack.c.bf16 %v277_v36, %v276_v35 }
 0x12f   :  { %v314_v25 = vsel %vm306_vm2, %v292_v37, 0 }
 0x130   :  { %v244_v39 = vpop.f32.mrf.mxu1 }
 0x131   :  { %v245_v16 = vadd.f32 %v415_v24, %v244_v39 }
 0x133   :  { %v278_v21 = vmax.f32 %v245_v16, 0.0 }
 0x138   :  { %v246_v41 = vpop.f32.mrf.mxu1 }
 0x139   :  { %v247_v14 = vadd.f32 %v415_v24, %v246_v41 }
 0x13b   :  { %v279_v17 = vmax.f32 %v247_v14, 0.0 }
 0x13d   :  { %v293_v22 = vpack.c.bf16 %v279_v17, %v278_v21 }
 0x13f   :  { %v317_v23 = vsel %vm306_vm2, %v293_v22, 0 }
 0x140   :  { %v249_v44 = vpop.f32.mrf.mxu1 }
 0x141   :  { %v250_v10 = vadd.f32 %v415_v24, %v249_v44 }
 0x143   :  { %v280_v13 = vmax.f32 %v250_v10, 0.0 }
 0x148   :  { %v251_v46 = vpop.f32.mrf.mxu1 }
 0x149   :  { %v252_v8 = vadd.f32 %v415_v24, %v251_v46 }
 0x14b   :  { %v281_v11 = vmax.f32 %v252_v8, 0.0 }
 0x14d   :  { %v294_v15 = vpack.c.bf16 %v281_v11, %v280_v13 }
 0x14f   :  { %v320_v18 = vsel %vm306_vm2, %v294_v15, 0 }
 0x150   :  { %v254_v55 = vpop.f32.mrf.mxu1 }
 0x151   :  { %v255_v4 = vadd.f32 %v415_v24, %v254_v55 }
 0x153   :  { %v282_v7 = vmax.f32 %v255_v4, 0.0 }
 0x158   :  { %v256_v0 = vpop.f32.mrf.mxu1 }
 0x159   :  { %v257_v2 = vadd.f32 %v415_v24, %v256_v0 }
 0x15b   :  { %v283_v5 = vmax.f32 %v257_v2, 0.0 }
 0x15d   :  { %v295_v9 = vpack.c.bf16 %v283_v5, %v282_v7 }
 0x15f   :  { %v323_v12 = vsel %vm306_vm2, %v295_v9, 0 }
 0x166   :  { %v259_v38 = vpop.f32.mrf.mxu3 }
 0x167   :  { %v260_v61 = vadd.f32 %v415_v24, %v259_v38 }
 0x169   :  { %v284_v1 = vmax.f32 %v260_v61, 0.0 }
 0x16e   :  { %v261_v40 = vpop.f32.mrf.mxu3 }
 0x16f   :  { %v262_v59 = vadd.f32 %v415_v24, %v261_v40 }
 0x171   :  { %v285_v62 = vmax.f32 %v262_v59, 0.0 }
 0x173   :  { %v296_v3 = vpack.c.bf16 %v285_v62, %v284_v1 }
 0x175   :  { %v326_v6 = vsel %vm306_vm2, %v296_v3, 0 }
 0x176   :  { %v264_v42 = vpop.f32.mrf.mxu3 }
 0x177   :  { %v265_v53 = vadd.f32 %v415_v24, %v264_v42 }
 0x179   :  { %v286_v58 = vmax.f32 %v265_v53, 0.0 }
 0x17e   :  { %v266_v43 = vpop.f32.mrf.mxu3 }
 0x17f   :  { %v267_v50 = vadd.f32 %v415_v24, %v266_v43 }
 0x181   :  { %v287_v56 = vmax.f32 %v267_v50, 0.0 }
 0x183   :  { %v297_v60 = vpack.c.bf16 %v287_v56, %v286_v58 }
 0x185   :  { %v329_v63 = vsel %vm306_vm2, %v297_v60, 0 }
 0x186   :  { %v269_v45 = vpop.f32.mrf.mxu3 }
 0x187   :  { %v270_v47 = vadd.f32 %v415_v24, %v269_v45 }
 0x189   :  { %v288_v51 = vmax.f32 %v270_v47, 0.0 }
 0x18e   :  { %v271_v48 = vpop.f32.mrf.mxu3 }
 0x18f   :  { %v272_v49 = vadd.f32 %v415_v24, %v271_v48  ;;  %v290_v24 = vld [vmem:[%s595_s5] sm:$0x1] }
 0x191   :  { %v289_v52 = vmax.f32 %v272_v49, 0.0 }
 0x193   :  { %v298_v54 = vpack.c.bf16 %v289_v52, %v288_v51 }
 0x195   :  { %v332_v57 = vsel %vm306_vm2, %v298_v54, 0 }
 0x196   :  { %334 = vmatpush.bf16.xpose.msra.mxu2 %v332_v57 }
 0x19e   :  { %335 = vmatpush.bf16.xpose.msra.mxu2 %v329_v63 }
 0x1a6   :  { %336 = vmatpush.bf16.xpose.msra.mxu2 %v326_v6 }
 0x1ae   :  { %337 = vmatpush.bf16.xpose.msra.mxu2 %v323_v12 }
 0x1b6   :  { %338 = vmatpush.bf16.xpose.msra.mxu2 %v320_v18 }
 0x1be   :  { %339 = vmatpush.bf16.xpose.msra.mxu2 %v317_v23 }
 0x1c6   :  { %340 = vmatpush.bf16.xpose.msra.mxu2 %v314_v25 }
 0x1ce   :  { %341 = vmatpush.bf16.xpose.msra.mxu2 %v311_v26 }
 0x1d5   :  { %400 = vmatmul.msk.bf16.vlgmr.msra.gmra.mxu2 %vm306_vm2, %v290_v24 }
 0x258   :  { %v343_v29 = vpop.f32.mrf.mxu2 }
 0x259   :  { %v344_v32 = vadd.f32 %v343_v29, %v305_v28 }
 0x25b   :  { %347 = vst [vmem:[#allocation3] sm:$0x1] %v344_v32 }
 0x25c   :  { %358 = dma.vmem_to_hbm [thread:$0]  %s354_s21, 16, %s356_s24, [#allocation4]  }
 0x260   :  { %v345_v30 = vpop.f32.mrf.mxu2 }
 0x261   :  { %440 = dma.done.wait [#allocation4], 16  }
 0x262   :  { %441 = vsyncadd [#allocation4], 4294967280 }
 0x263   :  { %363 = vsyncpa [#allocation4], 1 }

</bundles_post_ra>
